<compile_context>
chip_gen: v7x
topology: tpu7x:2x2x1
jax: 0.10.0
libtpu: 0.0.40
codegen_flags: <defaults>
</compile_context>

<pallas_src>
import jax
import jax.numpy as jnp
from jax.experimental import pallas as pl
from jax.experimental.pallas import tpu as pltpu


def _round_up(x, m):
    return ((x + m - 1) // m) * m


def _pad_feature_dim(d):
    # v6e/v7x MXU is 256 wide: pad large feature dims to 256 granularity for
    # fuller passes; keep 128 for small dims to avoid blowing up padded FLOPs.
    return _round_up(d, 256 if d >= 256 else 128)


def value_net_kernel(x_ref, w1_ref, b1_ref, w2_ref, b2_ref, w3_ref, b3_ref,
                     o_ref):
    # fc1: (TILE_B, S) @ (S, H) on the MXU with f32 accumulation; bias + ReLU
    # on the VPU in f32 (v5e has no bf16 VALU path, so the epilogue stays f32).
    h1 = jnp.dot(x_ref[...], w1_ref[...], preferred_element_type=jnp.float32)
    h1 = jnp.maximum(h1 + b1_ref[...], 0.0)
    # Dropout(0.2): eval-mode identity.

    # fc2: (TILE_B, H) @ (H, H).
    h2 = jnp.dot(h1.astype(w2_ref.dtype), w2_ref[...],
                 preferred_element_type=jnp.float32)
    h2 = jnp.maximum(h2 + b2_ref[...], 0.0)
    # Dropout(0.2): eval-mode identity.

    # fc3: (TILE_B, H) @ (H, 1).  Plain matmul against the (H, 1) column -> no
    # full-tile transpose of h2 at large TILE_B; (TILE_B, 1) output is tiny.
    v = jnp.dot(h2.astype(w3_ref.dtype), w3_ref[...],
                preferred_element_type=jnp.float32)
    o_ref[...] = (v + b3_ref[0]).astype(o_ref.dtype)


def prepare_params(params, *, compute_dtype=jnp.bfloat16):
    """Pad + cast parameters ONCE (hoisted out of the per-call path).

    Zero padding is mathematically inert: padded weight rows/cols and biases
    are zero, and padded batch rows are sliced off by the wrapper.
    """
    w1, b1, w2, b2, w3, b3 = params
    S, H = w1.shape
    S_pad, H_pad = _pad_feature_dim(S), _pad_feature_dim(H)
    cdt, f32 = compute_dtype, jnp.float32

    w1p = jnp.zeros((S_pad, H_pad), cdt).at[:S, :H].set(w1.astype(cdt))
    b1p = jnp.zeros((1, H_pad), f32).at[:, :H].set(
        jnp.reshape(b1, (1, H)).astype(f32))
    w2p = jnp.zeros((H_pad, H_pad), cdt).at[:H, :H].set(w2.astype(cdt))
    b2p = jnp.zeros((1, H_pad), f32).at[:, :H].set(
        jnp.reshape(b2, (1, H)).astype(f32))
    w3p = jnp.zeros((H_pad, 1), cdt).at[:H, :].set(
        jnp.reshape(w3, (H, 1)).astype(cdt))
    b3p = jnp.asarray(b3, f32).reshape((1,))   # 1-D SMEM scalar (no 2-D SMEM pad)

    return dict(w1=w1p, b1=b1p, w2=w2p, b2=b2p, w3=w3p, b3=b3p,
                S=S, H=H, S_pad=S_pad, H_pad=H_pad, compute_dtype=cdt)


def _vmem_estimate(tile_b, S_pad, H_pad, cbytes):
    # Pallas double-buffers every BlockSpec (even constant-index weights).
    x_buf = 2 * tile_b * S_pad * cbytes
    w_buf = 2 * (S_pad * H_pad + H_pad * H_pad) * cbytes
    w3_buf = 2 * H_pad * 128 * cbytes        # (H_pad, 1) block lane-pads to 128
    b_buf = 2 * 2 * 8 * H_pad * 4            # (1, H_pad) f32 biases sublane-pad to 8
    o_buf = 2 * tile_b * 128 * 4             # (tile_b, 1) block lane-pads to 128
    act = 2 * tile_b * H_pad * 4             # live f32 h1/h2 intermediates
    return x_buf + w_buf + w3_buf + b_buf + o_buf + act


_VMEM_TILE_BUDGET = 40 << 20   # keeps the derived limit below v7x's 64 MiB physical


def _choose_tile_b(B, S_pad, H_pad, cbytes, max_tile_b=512):
    b8 = _round_up(B, 8)
    if b8 <= 256:
        tile_b = b8                            # small batch: one grid step
    else:
        # Keep nb >= 2 so the "parallel" grid axis can shard across both v7x
        # TensorCores, and cap at 512 rows (fills the 256-wide MXU M dim and
        # amortizes per-grid-step pipeline overhead).
        tile_b = min(max_tile_b, _round_up((b8 + 1) // 2, 8))
    while tile_b > 8 and _vmem_estimate(tile_b, S_pad, H_pad, cbytes) > _VMEM_TILE_BUDGET:
        tile_b = _round_up(tile_b // 2, 8)
    return tile_b


def value_network_forward(x, prepared, *, tile_b=None):
    """x: [B, S] float -> [B, 1] float32, using prepare_params() output."""
    cdt = prepared["compute_dtype"]
    S, S_pad, H_pad = prepared["S"], prepared["S_pad"], prepared["H_pad"]
    B = x.shape[0]
    assert x.shape[1] == S, (x.shape, S)
    cbytes = jnp.dtype(cdt).itemsize

    if tile_b is None:
        tile_b = _choose_tile_b(B, S_pad, H_pad, cbytes)
    assert tile_b % 8 == 0, "tile_b must be a sublane multiple"
    B_pad = _round_up(B, tile_b)
    nb = B_pad // tile_b

    # Skip the activation pad/copy entirely when x is already aligned.
    if B_pad == B and S_pad == S:
        xp = x if x.dtype == cdt else x.astype(cdt)
    else:
        xp = jnp.zeros((B_pad, S_pad), cdt).at[:B, :S].set(x.astype(cdt))

    flops = 2 * B_pad * (S_pad * H_pad + H_pad * H_pad + H_pad)
    bytes_accessed = (
        (B_pad * S_pad + S_pad * H_pad + H_pad * H_pad + H_pad) * cbytes
        + (2 * H_pad + 1) * 4      # f32 biases
        + B_pad * 4)               # f32 output
    # VMEM limit derived from actual block sizes (with headroom), capped below
    # v7x's 64 MiB physical VMEM; v5e/v6e have 128 MiB so the cap is safe there.
    vmem_limit = int(min(max(1.25 * _vmem_estimate(tile_b, S_pad, H_pad, cbytes)
                             + (2 << 20), 32 << 20), 56 << 20))

    out = pl.pallas_call(
        value_net_kernel,
        out_shape=jax.ShapeDtypeStruct((B_pad, 1), jnp.float32),
        grid_spec=pltpu.PrefetchScalarGridSpec(
            num_scalar_prefetch=0,
            grid=(nb,),
            in_specs=[
                # x: one batch tile per grid step (pipelined/double-buffered).
                pl.BlockSpec((tile_b, S_pad), lambda i: (i, 0)),
                # Weights & biases: constant index_map -> stay VMEM-resident.
                pl.BlockSpec((S_pad, H_pad), lambda i: (0, 0)),
                pl.BlockSpec((1, H_pad), lambda i: (0, 0)),
                pl.BlockSpec((H_pad, H_pad), lambda i: (0, 0)),
                pl.BlockSpec((1, H_pad), lambda i: (0, 0)),
                pl.BlockSpec((H_pad, 1), lambda i: (0, 0)),
                # fc3 bias: single f32 scalar, 1-D, in SMEM.
                pl.BlockSpec(memory_space=pltpu.MemorySpace.SMEM),
            ],
            out_specs=pl.BlockSpec((tile_b, 1), lambda i: (i, 0)),
        ),
        compiler_params=pltpu.CompilerParams(
            dimension_semantics=("parallel",),   # megacore sharding on v7x
            vmem_limit_bytes=vmem_limit,
        ),
        cost_estimate=pl.CostEstimate(
            flops=flops, transcendentals=0, bytes_accessed=bytes_accessed),
    )(xp, prepared["w1"], prepared["b1"], prepared["w2"], prepared["b2"],
      prepared["w3"], prepared["b3"])

    return out[:B]   # (B, 1) float32


def init_params(key, state_dim, hidden_dim):
    """Deterministic init mimicking nn.Linear's U(-1/sqrt(fan_in), 1/sqrt(fan_in))."""
    ks = jax.random.split(key, 6)

    def linear(kw, kb, fan_in, fan_out):
        bound = float(1.0 / (fan_in ** 0.5))
        w = jax.random.uniform(kw, (fan_in, fan_out), jnp.float32, -bound, bound)
        b = jax.random.uniform(kb, (1, fan_out), jnp.float32, -bound, bound)
        return w, b

    w1, b1 = linear(ks[0], ks[1], state_dim, hidden_dim)
    w2, b2 = linear(ks[2], ks[3], hidden_dim, hidden_dim)
    w3, b3 = linear(ks[4], ks[5], hidden_dim, 1)
    return (w1, b1, w2, b2, w3, b3)


def reference_forward(x, params):
    w1, b1, w2, b2, w3, b3 = params
    h1 = jnp.maximum(x @ w1 + b1, 0.0)
    h2 = jnp.maximum(h1 @ w2 + b2, 0.0)
    return h2 @ w3 + b3


if __name__ == "__main__":
    B, STATE_DIM, HIDDEN_DIM = 8, 16, 32

    key = jax.random.PRNGKey(0)
    k_params, k_x = jax.random.split(key)
    params = init_params(k_params, STATE_DIM, HIDDEN_DIM)
    x = jax.random.normal(k_x, (B, STATE_DIM), jnp.float32)

    ref = reference_forward(x, params)

    # f32 matmul path (exact-ish parity check).
    prep_f32 = prepare_params(params, compute_dtype=jnp.float32)
    out_f32 = jax.block_until_ready(value_network_forward(x, prep_f32))
    assert out_f32.shape == (B, 1), out_f32.shape
    assert jnp.allclose(out_f32, ref, atol=1e-3, rtol=1e-3), "f32 mismatch vs reference"

    # Default path: bf16 MXU operands, f32 accumulation + f32 epilogue.
    prep_bf16 = prepare_params(params)   # compute_dtype=bfloat16 default
    out_bf16 = jax.block_until_ready(value_network_forward(x, prep_bf16))
    assert out_bf16.shape == (B, 1), out_bf16.shape
    assert jnp.allclose(out_bf16, ref, atol=5e-2, rtol=5e-2), "bf16 mismatch vs reference"

    print("KERNEL_OK")
</pallas_src>

<mosaic_0001>
module attributes {stable_mosaic.version = 11 : i64} {
  func.func @value_net_kernel(%arg0: i32, %arg1: memref<8x128xf32, #tpu.memory_space<vmem>>, %arg2: memref<128x128xf32, #tpu.memory_space<vmem>>, %arg3: memref<1x128xf32, #tpu.memory_space<vmem>>, %arg4: memref<128x128xf32, #tpu.memory_space<vmem>>, %arg5: memref<1x128xf32, #tpu.memory_space<vmem>>, %arg6: memref<128x1xf32, #tpu.memory_space<vmem>>, %arg7: memref<1xf32, #tpu.memory_space<smem>>, %arg8: memref<8x1xf32, #tpu.memory_space<vmem>>) attributes {dimension_semantics = [#tpu.dimension_semantics<parallel>], iteration_bounds = array<i64: 1>, scalar_prefetch = 0 : i64, scratch_operands = 0 : i64, tpu.core_type = #tpu.core_type<tc>, window_params = [{transform_indices = @transform_0, window_bounds = array<i64: 8, 128>}, {pipeline_mode = #tpu.pipeline_mode<synchronous>, transform_indices = @transform_1, window_bounds = array<i64: 128, 128>}, {pipeline_mode = #tpu.pipeline_mode<synchronous>, transform_indices = @transform_2, window_bounds = array<i64: 1, 128>}, {pipeline_mode = #tpu.pipeline_mode<synchronous>, transform_indices = @transform_3, window_bounds = array<i64: 128, 128>}, {pipeline_mode = #tpu.pipeline_mode<synchronous>, transform_indices = @transform_4, window_bounds = array<i64: 1, 128>}, {pipeline_mode = #tpu.pipeline_mode<synchronous>, transform_indices = @transform_5, window_bounds = array<i64: 128, 1>}, {transform_indices = @transform_6, window_bounds = array<i64: 1>}, {transform_indices = @transform_7, window_bounds = array<i64: 8, 1>}]} {
    %c0 = arith.constant 0 : index
    %c0_0 = arith.constant 0 : index
    %0 = vector.load %arg1[%c0, %c0_0] : memref<8x128xf32, #tpu.memory_space<vmem>>, vector<8x128xf32>
    %c0_1 = arith.constant 0 : index
    %c0_2 = arith.constant 0 : index
    %1 = vector.load %arg2[%c0_1, %c0_2] : memref<128x128xf32, #tpu.memory_space<vmem>>, vector<128x128xf32>
    %cst = arith.constant dense<0.000000e+00> : vector<8x128xf32>
    %2 = tpu.matmul %0, %1, %cst {dimension_numbers = #tpu.dot_dimension_numbers<[1], [0], [0], [1], [0, 0, 1, 1], [], []>} : vector<8x128xf32>, vector<128x128xf32>, vector<8x128xf32> -> vector<8x128xf32>
    %c0_3 = arith.constant 0 : index
    %c0_4 = arith.constant 0 : index
    %3 = vector.load %arg3[%c0_3, %c0_4] : memref<1x128xf32, #tpu.memory_space<vmem>>, vector<1x128xf32>
    %4 = vector.broadcast %3 : vector<1x128xf32> to vector<8x128xf32>
    %5 = arith.addf %2, %4 : vector<8x128xf32>
    %cst_5 = arith.constant 0.000000e+00 : f32
    %6 = vector.broadcast %cst_5 : f32 to vector<8x128xf32>
    %7 = arith.maximumf %5, %6 : vector<8x128xf32>
    %c0_6 = arith.constant 0 : index
    %c0_7 = arith.constant 0 : index
    %8 = vector.load %arg4[%c0_6, %c0_7] : memref<128x128xf32, #tpu.memory_space<vmem>>, vector<128x128xf32>
    %cst_8 = arith.constant dense<0.000000e+00> : vector<8x128xf32>
    %9 = tpu.matmul %7, %8, %cst_8 {dimension_numbers = #tpu.dot_dimension_numbers<[1], [0], [0], [1], [0, 0, 1, 1], [], []>} : vector<8x128xf32>, vector<128x128xf32>, vector<8x128xf32> -> vector<8x128xf32>
    %c0_9 = arith.constant 0 : index
    %c0_10 = arith.constant 0 : index
    %10 = vector.load %arg5[%c0_9, %c0_10] : memref<1x128xf32, #tpu.memory_space<vmem>>, vector<1x128xf32>
    %11 = vector.broadcast %10 : vector<1x128xf32> to vector<8x128xf32>
    %12 = arith.addf %9, %11 : vector<8x128xf32>
    %cst_11 = arith.constant 0.000000e+00 : f32
    %13 = vector.broadcast %cst_11 : f32 to vector<8x128xf32>
    %14 = arith.maximumf %12, %13 : vector<8x128xf32>
    %c0_12 = arith.constant 0 : index
    %c0_13 = arith.constant 0 : index
    %15 = vector.load %arg6[%c0_12, %c0_13] : memref<128x1xf32, #tpu.memory_space<vmem>>, vector<128x1xf32>
    %cst_14 = arith.constant dense<0.000000e+00> : vector<8x1xf32>
    %16 = tpu.matmul %14, %15, %cst_14 {dimension_numbers = #tpu.dot_dimension_numbers<[1], [0], [0], [1], [0, 0, 1, 1], [], []>} : vector<8x128xf32>, vector<128x1xf32>, vector<8x1xf32> -> vector<8x1xf32>
    %c0_15 = arith.constant 0 : index
    %17 = memref.load %arg7[%c0_15] : memref<1xf32, #tpu.memory_space<smem>>
    %18 = vector.broadcast %17 : f32 to vector<8x1xf32>
    %19 = arith.addf %16, %18 : vector<8x1xf32>
    %c0_16 = arith.constant 0 : index
    %c0_17 = arith.constant 0 : index
    %20 = vector.load %arg8[%c0_16, %c0_17] : memref<8x1xf32, #tpu.memory_space<vmem>>, vector<8x1xf32>
    tpu.vector_store %arg8[%c0_16, %c0_17], %19 {strides = array<i32>} : memref<8x1xf32, #tpu.memory_space<vmem>>, vector<8x1xf32>,
    return
  }
  func.func @transform_0(%arg0: i32) -> (i32, i32) {
    %c0_i32 = arith.constant 0 : i32
    %c0_i32_0 = arith.constant 0 : i32
    return %arg0, %c0_i32 : i32, i32
  }
  func.func @transform_1(%arg0: i32) -> (i32, i32) {
    %c0_i32 = arith.constant 0 : i32
    %c0_i32_0 = arith.constant 0 : i32
    %c0_i32_1 = arith.constant 0 : i32
    return %c0_i32, %c0_i32_0 : i32, i32
  }
  func.func @transform_2(%arg0: i32) -> (i32, i32) {
    %c0_i32 = arith.constant 0 : i32
    %c0_i32_0 = arith.constant 0 : i32
    %c0_i32_1 = arith.constant 0 : i32
    return %c0_i32, %c0_i32_0 : i32, i32
  }
  func.func @transform_3(%arg0: i32) -> (i32, i32) {
    %c0_i32 = arith.constant 0 : i32
    %c0_i32_0 = arith.constant 0 : i32
    %c0_i32_1 = arith.constant 0 : i32
    return %c0_i32, %c0_i32_0 : i32, i32
  }
  func.func @transform_4(%arg0: i32) -> (i32, i32) {
    %c0_i32 = arith.constant 0 : i32
    %c0_i32_0 = arith.constant 0 : i32
    %c0_i32_1 = arith.constant 0 : i32
    return %c0_i32, %c0_i32_0 : i32, i32
  }
  func.func @transform_5(%arg0: i32) -> (i32, i32) {
    %c0_i32 = arith.constant 0 : i32
    %c0_i32_0 = arith.constant 0 : i32
    %c0_i32_1 = arith.constant 0 : i32
    return %c0_i32, %c0_i32_0 : i32, i32
  }
  func.func @transform_6(%arg0: i32) -> i32 {
    %c0_i32 = arith.constant 0 : i32
    %c0_i32_0 = arith.constant 0 : i32
    return %c0_i32 : i32
  }
  func.func @transform_7(%arg0: i32) -> (i32, i32) {
    %c0_i32 = arith.constant 0 : i32
    %c0_i32_0 = arith.constant 0 : i32
    return %arg0, %c0_i32 : i32, i32
  }
}

</mosaic_0001>

<bundles_post_ra>
// kernel: tpu_custom_call.1
= control target key start
LH: loop header
LB: loop body
LE: loop exit
PB: predicated region body
PF: predicated region fallthrough
CT: control target
= control target key end

     0   :  { %13 = vsyncpa [#allocation4], 0  ;;  %s585_s24 = smov [#allocation3]   ;;  %s784_s0 = inlined_call_operand.vmem [shape: f32[8,128], index: 0, kind: input, shape index: {}]   ;;  %s785_s1 = inlined_call_operand.vmem [shape: f32[128,128], index: 1, kind: input, shape index: {}]   ;;  %s786_s2 = inlined_call_operand.vmem [shape: f32[1,128], index: 2, kind: input, shape index: {}]   ;;  %s787_s3 = inlined_call_operand.hbm [shape: f32[128,128], index: 3, kind: input, shape index: {}]   ;;  %s788_s4 = inlined_call_operand.vmem [shape: f32[1,128], index: 4, kind: input, shape index: {}]   ;;  %s789_s5 = inlined_call_operand.vmem [shape: f32[128,1], index: 5, kind: input, shape index: {}]   ;;  %s790_s6 = inlined_call_operand.<no memory space> [shape: f32[1], index: 6, kind: input, shape index: {}]   ;;  %s791_s7 = inlined_call_operand.vmem [shape: f32[8,1], index: 7, kind: output, shape index: {}]  }
   0x1   :  { %s25_s25 = sshll.u32 %s585_s24, 4  ;;  %s561_s28 = scalar_lea.hbm %s787_s3, 2048  ;;  %s26_s25 = int_to_ptr.vmem [resolvable:$true] %s25_s25 }
   0x2   :  { %p562_p0 = scmp.ne.s32.totalorder %s787_s3, %s561_s28  ;;  %p565_p1 = scmp.lt.u32.totalorder %s561_s28, %s787_s3 }
   0x4   :  { %p567_p2 = pnand %p565_p1, %p562_p0 }
   0x6   :  { %570 = shalt.err (!%p567_p2)
}
   0x7   :  { %s571_s10 = scalar_lea.vmem %s26_s25, 2048  ;;  %p576_p4 = scmp.lt.s32.totalorder %s26_s25, %s26_s25 }
   0x8   :  { %p572_p3 = scmp.ne.s32.totalorder %s26_s25, %s571_s10  ;;  %p577_p5 = scmp.lt.s32.totalorder %s571_s10, %s571_s10 }
   0xa   :  { %p578_p6 = por %p577_p5, %p576_p4 }
   0xc   :  { %p579_p7 = pnand %p578_p6, %p572_p3 }
   0xe   :  { %582 = shalt.err (!%p579_p7)
}
   0xf   :  { %s586_s11 = smov 128   ;;  %s587_s12 = smov 8  }
  0x10   :  { %31 = dma.hbm_to_vmem [thread:$0]  %s787_s3, 2048, %s26_s25, [#allocation4], %s586_s11, %s586_s11, %s587_s12  }
  0x11   :  { %583 = dma.done.wait [#allocation4], 2048  }
  0x12   :  { %584 = vsyncadd [#allocation4], 4294965248  ;;  %v588_v0 = vmov 0.0|0.0   ;;  %vm589_vm0 = vmmov 0   ;;  %v590_v1 = vmov 0.0   ;;  %v42_v2 = vld [vmem:[%s785_s1] sm:$0xff] }
  0x13   :  { %483 = vmatprep.subr.bf16.mxu0 %v588_v0  ;;  %410 = vmatprep.mubr.msk.f32.mxu0 %vm589_vm0, %v590_v1  ;;  %v43_v3 = vld [vmem:[%s785_s1 + $0x8] sm:$0xff]  ;;  %v44_v4 = vld [vmem:[%s785_s1 + $0x10] sm:$0xff]  ;;  %v45_v6 = vld [vmem:[%s785_s1 + $0x18] sm:$0xff]  ;;  %vm318_vm1 = vcmask 7168  }
  0x14   :  { %507 = vmatprep.subr.bf16.mxu1 %v588_v0  ;;  %445 = vmatprep.mubr.msk.f32.mxu1 %vm589_vm0, %v590_v1  ;;  %v484_v5 = vpack.c.bf16 %v43_v3, %v42_v2  ;;  %v487_v7 = vpack.c.bf16 %v45_v6, %v44_v4  ;;  %v46_v8 = vld [vmem:[%s785_s1 + $0x20] sm:$0xff]  ;;  %v47_v9 = vld [vmem:[%s785_s1 + $0x28] sm:$0xff]  ;;  %v138_v12 = vld [vmem:[#allocation3 + $0x10] sm:$0xff] }
  0x15   :  { %v136_v10 = vld [vmem:[#allocation3] sm:$0xff]  ;;  %v137_v11 = vld [vmem:[#allocation3 + $0x8] sm:$0xff]  ;;  %v139_v13 = vld [vmem:[#allocation3 + $0x18] sm:$0xff]  ;;  %v490_v14 = vpack.c.bf16 %v47_v9, %v46_v8 }
  0x16   :  { %485 = vmatpush3.bf16.msra.mxu0 %v484_v5  ;;  %v508_v15 = vpack.c.bf16 %v137_v11, %v136_v10  ;;  %v48_v16 = vld [vmem:[%s785_s1 + $0x30] sm:$0xff]  ;;  %v49_v17 = vld [vmem:[%s785_s1 + $0x38] sm:$0xff]  ;;  %v511_v18 = vpack.c.bf16 %v139_v13, %v138_v12  ;;  %v140_v19 = vld [vmem:[#allocation3 + $0x20] sm:$0xff] }
  0x17   :  { %486 = vmatprep.subr.bf16.mxu0 %v588_v0  ;;  %v141_v20 = vld [vmem:[#allocation3 + $0x28] sm:$0xff]  ;;  %v493_v21 = vpack.c.bf16 %v49_v17, %v48_v16  ;;  %v50_v22 = vld [vmem:[%s785_s1 + $0x40] sm:$0xff]  ;;  %v142_v25 = vld [vmem:[#allocation3 + $0x30] sm:$0xff] }
  0x18   :  { %509 = vmatpush3.bf16.msra.mxu1 %v508_v15  ;;  %v51_v23 = vld [vmem:[%s785_s1 + $0x48] sm:$0xff]  ;;  %v514_v24 = vpack.c.bf16 %v141_v20, %v140_v19  ;;  %v143_v26 = vld [vmem:[#allocation3 + $0x38] sm:$0xff]  ;;  %v52_v28 = vld [vmem:[%s785_s1 + $0x50] sm:$0xff] }
  0x19   :  { %510 = vmatprep.subr.bf16.mxu1 %v588_v0  ;;  %v496_v27 = vpack.c.bf16 %v51_v23, %v50_v22  ;;  %v53_v29 = vld [vmem:[%s785_s1 + $0x58] sm:$0xff]  ;;  %v517_v30 = vpack.c.bf16 %v143_v26, %v142_v25  ;;  %v144_v31 = vld [vmem:[#allocation3 + $0x40] sm:$0xff]  ;;  %v145_v32 = vld [vmem:[#allocation3 + $0x48] sm:$0xff] }
  0x1a   :  { %488 = vmatpush3.bf16.msra.mxu0 %v487_v7  ;;  %v499_v33 = vpack.c.bf16 %v53_v29, %v52_v28  ;;  %v54_v34 = vld [vmem:[%s785_s1 + $0x60] sm:$0xff]  ;;  %v55_v35 = vld [vmem:[%s785_s1 + $0x68] sm:$0xff]  ;;  %v520_v36 = vpack.c.bf16 %v145_v32, %v144_v31  ;;  %v146_v37 = vld [vmem:[#allocation3 + $0x50] sm:$0xff] }
  0x1b   :  { %489 = vmatprep.subr.bf16.mxu0 %v588_v0  ;;  %v147_v38 = vld [vmem:[#allocation3 + $0x58] sm:$0xff]  ;;  %v502_v39 = vpack.c.bf16 %v55_v35, %v54_v34  ;;  %v56_v40 = vld [vmem:[%s785_s1 + $0x70] sm:$0xff]  ;;  %v148_v43 = vld [vmem:[#allocation3 + $0x60] sm:$0xff] }
  0x1c   :  { %512 = vmatpush3.bf16.msra.mxu1 %v511_v18  ;;  %v57_v41 = vld [vmem:[%s785_s1 + $0x78] sm:$0xff]  ;;  %v523_v42 = vpack.c.bf16 %v147_v38, %v146_v37  ;;  %v149_v44 = vld [vmem:[#allocation3 + $0x68] sm:$0xff]  ;;  %v41_v47 = vld [vmem:[%s784_s0] sm:$0xff] }
  0x1d   :  { %513 = vmatprep.subr.bf16.mxu1 %v588_v0  ;;  %v505_v45 = vpack.c.bf16 %v57_v41, %v56_v40  ;;  %v526_v46 = vpack.c.bf16 %v149_v44, %v148_v43  ;;  %v150_v48 = vld [vmem:[#allocation3 + $0x70] sm:$0xff]  ;;  %v151_v49 = vld [vmem:[#allocation3 + $0x78] sm:$0xff]  ;;  %v230_v51 = vld [vmem:[%s789_s5] sm:$0xff] }
  0x1e   :  { %491 = vmatpush3.bf16.msra.mxu0 %v490_v14  ;;  %v529_v50 = vpack.c.bf16 %v151_v49, %v150_v48  ;;  %v231_v52 = vld [vmem:[%s789_s5 + $0x8] sm:$0xff]  ;;  %v232_v53 = vld [vmem:[%s789_s5 + $0x10] sm:$0xff]  ;;  %v233_v55 = vld [vmem:[%s789_s5 + $0x18] sm:$0xff] }
  0x1f   :  { %492 = vmatprep.subr.bf16.mxu0 %v588_v0  ;;  %v532_v54 = vpack.c.bf16 %v231_v52, %v230_v51  ;;  %v535_v56 = vpack.c.bf16 %v233_v55, %v232_v53  ;;  %v234_v57 = vld [vmem:[%s789_s5 + $0x20] sm:$0xff]  ;;  %v235_v58 = vld [vmem:[%s789_s5 + $0x28] sm:$0xff]  ;;  %v236_v60 = vld [vmem:[%s789_s5 + $0x30] sm:$0xff] }
  0x20   :  { %515 = vmatpush3.bf16.msra.mxu1 %v514_v24  ;;  %v538_v59 = vpack.c.bf16 %v235_v58, %v234_v57  ;;  %v237_v61 = vld [vmem:[%s789_s5 + $0x38] sm:$0xff]  ;;  %v238_v63 = vld [vmem:[%s789_s5 + $0x40] sm:$0xff]  ;;  %v240_v3 = vld [vmem:[%s789_s5 + $0x50] sm:$0xff] }
  0x21   :  { %516 = vmatprep.subr.bf16.mxu1 %v588_v0  ;;  %v541_v62 = vpack.c.bf16 %v237_v61, %v236_v60  ;;  %v241_v4 = vld [vmem:[%s789_s5 + $0x58] sm:$0xff]  ;;  %v242_v6 = vld [vmem:[%s789_s5 + $0x60] sm:$0xff]  ;;  %v243_v7 = vld [vmem:[%s789_s5 + $0x68] sm:$0xff] }
  0x22   :  { %494 = vmatpush3.bf16.msra.mxu0 %v493_v21  ;;  %v547_v5 = vpack.c.bf16 %v241_v4, %v240_v3  ;;  %v550_v8 = vpack.c.bf16 %v243_v7, %v242_v6  ;;  %v325_v9 = vld [vmem:[%s786_s2] ss:$0 sm:$0xff]  ;;  %v244_v14 = vld [vmem:[%s789_s5 + $0x70] sm:$0xff]  ;;  %v245_v15 = vld [vmem:[%s789_s5 + $0x78] sm:$0xff]  ;;  %v247_v21 = vstv %s790_s6 }
  0x23   :  { %495 = vmatprep.subr.bf16.mxu0 %v588_v0  ;;  %v553_v16 = vpack.c.bf16 %v245_v15, %v244_v14 }
  0x24   :  { %518 = vmatpush3.bf16.msra.mxu1 %v517_v30 }
  0x25   :  { %519 = vmatprep.subr.bf16.mxu1 %v588_v0 }
  0x26   :  { %497 = vmatpush3.bf16.msra.mxu0 %v496_v27 }
  0x27   :  { %498 = vmatprep.subr.bf16.mxu0 %v588_v0 }
  0x28   :  { %521 = vmatpush3.bf16.msra.mxu1 %v520_v36 }
  0x29   :  { %522 = vmatprep.subr.bf16.mxu1 %v588_v0 }
  0x2a   :  { %500 = vmatpush3.bf16.msra.mxu0 %v499_v33 }
  0x2b   :  { %501 = vmatprep.subr.bf16.mxu0 %v588_v0 }
  0x2c   :  { %524 = vmatpush3.bf16.msra.mxu1 %v523_v42 }
  0x2d   :  { %525 = vmatprep.subr.bf16.mxu1 %v588_v0 }
  0x2e   :  { %503 = vmatpush3.bf16.msra.mxu0 %v502_v39 }
  0x2f   :  { %504 = vmatprep.subr.bf16.mxu0 %v588_v0 }
  0x30   :  { %527 = vmatpush3.bf16.msra.mxu1 %v526_v46 }
  0x31   :  { %528 = vmatprep.subr.bf16.mxu1 %v588_v0 }
  0x32   :  { %506 = vmatpush3.bf16.msra.mxu0 %v505_v45 }
  0x33   :  { %531 = vmatprep.subr.bf16.mxu0 %v588_v0 }
  0x34   :  { %530 = vmatpush3.bf16.msra.mxu1 %v529_v50 }
  0x35   :  { %411 = vmatmul.mubr.f32.vlgmr.msra.gmra.mrb[0].mxu0 %v41_v47 }
  0x36   :  { %480 = vmatprep.mubr.msk.f32.mxu0 %vm589_vm0, %v590_v1  ;;  %533 = vmatpush3.bf16.msra.mxu0 %v532_v54  ;;  %v239_v1 = vld [vmem:[%s789_s5 + $0x48] sm:$0xff] }
  0x37   :  { %534 = vmatprep.subr.bf16.mxu0 %v588_v0  ;;  %v544_v2 = vpack.c.bf16 %v239_v1, %v238_v63 }
  0x3a   :  { %536 = vmatpush3.bf16.msra.mxu0 %v535_v56 }
  0x3b   :  { %537 = vmatprep.subr.bf16.mxu0 %v588_v0 }
  0x3e   :  { %539 = vmatpush3.bf16.msra.mxu0 %v538_v59 }
  0x3f   :  { %540 = vmatprep.subr.bf16.mxu0 %v588_v0 }
  0x42   :  { %542 = vmatpush3.bf16.msra.mxu0 %v541_v62 }
  0x43   :  { %543 = vmatprep.subr.bf16.mxu0 %v588_v0 }
  0x46   :  { %545 = vmatpush3.bf16.msra.mxu0 %v544_v2 }
  0x47   :  { %546 = vmatprep.subr.bf16.mxu0 %v588_v0 }
  0x4a   :  { %548 = vmatpush3.bf16.msra.mxu0 %v547_v5 }
  0x4b   :  { %549 = vmatprep.subr.bf16.mxu0 %v588_v0 }
  0x4e   :  { %551 = vmatpush3.bf16.msra.mxu0 %v550_v8 }
  0x4f   :  { %552 = vmatprep.subr.bf16.mxu0 %v588_v0  ;;  %v326_v0 = vld [vmem:[%s788_s4] ss:$0 sm:$0xff] }
  0x52   :  { %554 = vmatpush3.bf16.msra.mxu0 %v553_v16 }
 0x108   :  { %v131_v10 = vpop.f32.mrb[0].mxu0 }
 0x109   :  { %v132_v11 = vadd.f32 %v325_v9, %v131_v10  ;;  %v412_v12 = vpop.f32.mrb[1].mxu0 }
 0x10b   :  { %v135_v13 = vmax.f32 %v132_v11, 0.0 }
 0x10d   :  { %446 = vmatmul.mubr.f32.vlgmr.msra.gmra.mrb[0].mxu1 %v135_v13 }
 0x1e0   :  { %v225_v17 = vpop.f32.mrb[0].mxu1 }
 0x1e1   :  { %v226_v18 = vadd.f32 %v326_v0, %v225_v17  ;;  %v447_v19 = vpop.f32.mrb[1].mxu1 }
 0x1e3   :  { %v229_v20 = vmax.f32 %v226_v18, 0.0 }
 0x1e5   :  { %481 = vmatmul.mubr.f32.vlgmr.msra.gmra.mrb[2].mxu0 %v229_v20 }
 0x2b8   :  { %v314_v22 = vpop.f32.mrb[2].mxu0 }
 0x2b9   :  { %v315_v23 = vadd.f32 %v314_v22, %v247_v21  ;;  %v482_v24 = vpop.f32.mrb[3].mxu0 }
 0x2bb   :  { %319 = vst.msk [vmem:[%s791_s7] sm:$0xff] %vm318_vm1, %v315_v23 }
 0x2bc   :  { %324 = vsyncpa [#allocation4], 1 }

</bundles_post_ra>
